<compile_context>
chip_gen: v7x
topology: tpu7x:2x2x1
jax: 0.10.0
libtpu: 0.0.40
codegen_flags: <defaults>
</compile_context>

<pallas_src>
import jax
import jax.numpy as jnp
from jax.experimental import pallas as pl
from jax.experimental.pallas import tpu as pltpu


# --------------------------------------------------------------------------- #
# Kernels
# --------------------------------------------------------------------------- #
def _mean_pool_kernel_single(x_ref, len_ref, o_ref):
    """Whole sequence in one tile: no scratch accumulator needed."""
    # x_ref: (TB, S_f, D_f) source dtype; upcast happens per-vreg in the reduce.
    part = jnp.sum(x_ref[...].astype(jnp.float32), axis=1)        # (TB, D_f)
    inv_len = pl.reciprocal(len_ref[...], approx=False)           # (TB, 1) exact
    o_ref[...] = (part * inv_len).astype(o_ref.dtype)


def _mean_pool_kernel_multi(x_ref, len_ref, o_ref, acc_ref):
    """Sequence tiled along the last ('arbitrary') grid axis."""
    s = pl.program_id(1)

    @pl.when(s == 0)
    def _init():
        acc_ref[...] = jnp.zeros_like(acc_ref)

    acc_ref[...] += jnp.sum(x_ref[...].astype(jnp.float32), axis=1)

    @pl.when(s == pl.num_programs(1) - 1)
    def _finalize():
        inv_len = pl.reciprocal(len_ref[...], approx=False)        # exact, 1x/tile
        o_ref[...] = (acc_ref[...] * inv_len).astype(o_ref.dtype)


# --------------------------------------------------------------------------- #
# Tiling helpers
# --------------------------------------------------------------------------- #
def _sublane_multiple(itemsize):
    # f32 -> 8, bf16 -> 16, int8/fp8 -> 32 (packed-layout friendly).
    return {4: 8, 2: 16, 1: 32}.get(itemsize, 8)


def _fold_factor(S, D):
    """Largest k with (k*D) % 128 == 0 folding S -> S/k cleanly, else 1."""
    if D >= 128:
        return 1
    g = 1
    a, b = D, 128
    while b:
        a, b = b, a % b
    g = a  # gcd(D, 128)
    k = 128 // g
    if k <= S and S % k == 0:
        return k
    return 1


def _largest_divisor_multiple(total, multiple, cap):
    cap = min(cap, total)
    best, d = None, multiple
    while d <= cap:
        if total % d == 0:
            best = d
        d += multiple
    return best


def _smallest_divisor_multiple(total, multiple):
    d = multiple
    while d <= total:
        if total % d == 0:
            return d
        d += multiple
    return None


def _choose_tiles(B, S_f, D_f, itemsize, sub, target_bytes):
    """Pick (TB, TS) for the folded input (B, S_f, D_f).

    Accounts for VMEM lane/sublane padding, never falls back to the full
    extent when a smaller legal tile exists, and prefers >=2 batch tiles so
    the 'parallel' axis can use both v7x TensorCores.
    """
    lane_pad = -(-D_f // 128) * 128

    def x_tile_vmem(tb, ts):
        ts_pad = -(-ts // sub) * sub
        return tb * ts_pad * lane_pad * itemsize

    row_bytes = x_tile_vmem(1, S_f)
    if row_bytes <= target_bytes:
        # Whole (S_f, D_f) slab per batch element -> one contiguous DMA each.
        ts = S_f
        cap_tb = max(1, target_bytes // row_bytes)
        if B <= cap_tb:
            tb = B
        else:
            tb = (_largest_divisor_multiple(B, sub, cap_tb)
                  or _largest_divisor_multiple(B, 8, cap_tb)      # layout floor
                  or _smallest_divisor_multiple(B, 8)             # clamp, don't blow up
                  or B)
        # v7x megacore: prefer >=2 batch tiles when a legal split exists and
        # the resulting tiles stay large enough to amortize per-step overhead.
        if tb == B and B >= 2 * sub and row_bytes * (B // 2) >= (512 * 1024):
            half = (_largest_divisor_multiple(B, sub, B // 2)
                    or _largest_divisor_multiple(B, 8, B // 2))
            if half is not None:
                tb = half
    else:
        # A single full-sequence row already exceeds the budget: minimal TB,
        # tile the sequence axis instead.
        tb = (_smallest_divisor_multiple(B, sub)
              or _smallest_divisor_multiple(B, 8)
              or B)
        cap_ts = max(sub, target_bytes // max(1, tb * lane_pad * itemsize))
        ts = (_largest_divisor_multiple(S_f, sub, cap_ts)
              or _largest_divisor_multiple(S_f, 8, cap_ts)
              or _smallest_divisor_multiple(S_f, 8)
              or S_f)
    return tb, ts


# --------------------------------------------------------------------------- #
# Public entry point
# --------------------------------------------------------------------------- #
def mean_pooling(x, lengths, *, target_bytes=8 * 1024 * 1024):
    """Pallas equivalent of MeanPooling.forward.

    Args:
      x: (B, S, D) array (padded positions assumed zero).
      lengths: (B,) array (any numeric dtype); per-document divisor, >= 1
        (no divide-by-zero guard, same as the PyTorch module).
      target_bytes: per-tile input budget (default 8 MiB; double-buffered this
        stays under the 32 MiB vmem_limit_bytes set below on every chip).
    Returns:
      (B, D) array in x's dtype.
    """
    assert x.ndim == 3
    B, S, D = x.shape
    lengths_2d = jnp.reshape(lengths, (B, 1)).astype(jnp.float32)
    itemsize = jnp.dtype(x.dtype).itemsize
    sub = _sublane_multiple(itemsize)

    # Lane-dense fold: (B, S, D) -> (B, S/k, k*D); pure metadata reshape.
    k = _fold_factor(S, D)
    S_f, D_f = S // k, D * k
    x_f = x.reshape(B, S_f, D_f)

    TB, TS = _choose_tiles(B, S_f, D_f, itemsize, sub, target_bytes)
    grid_b, grid_s = B // TB, S_f // TS

    out_dtype = jnp.float32 if k > 1 else x.dtype
    out_shape = jax.ShapeDtypeStruct((B, D_f), out_dtype)

    cost = pl.CostEstimate(
        flops=B * S * D + B * D_f + B * D * max(0, k - 1),
        transcendentals=B,
        bytes_accessed=(B * S * D * itemsize + B * 4
                        + B * D_f * jnp.dtype(out_dtype).itemsize),
    )

    if grid_s == 1:
        cparams = pltpu.CompilerParams(
            dimension_semantics=("parallel",),
            vmem_limit_bytes=32 * 1024 * 1024,
        )
        out = pl.pallas_call(
            _mean_pool_kernel_single,
            out_shape=out_shape,
            grid=(grid_b,),
            in_specs=[
                pl.BlockSpec((TB, S_f, D_f), lambda b: (b, 0, 0)),
                pl.BlockSpec((TB, 1), lambda b: (b, 0)),
            ],
            out_specs=pl.BlockSpec((TB, D_f), lambda b: (b, 0)),
            compiler_params=cparams,
            cost_estimate=cost,
        )(x_f, lengths_2d)
    else:
        cparams = pltpu.CompilerParams(
            dimension_semantics=("parallel", "arbitrary"),
            vmem_limit_bytes=32 * 1024 * 1024,
        )
        out = pl.pallas_call(
            _mean_pool_kernel_multi,
            out_shape=out_shape,
            grid=(grid_b, grid_s),
            in_specs=[
                pl.BlockSpec((TB, TS, D_f), lambda b, s: (b, s, 0)),
                pl.BlockSpec((TB, 1), lambda b, s: (b, 0)),
            ],
            out_specs=pl.BlockSpec((TB, D_f), lambda b, s: (b, 0)),
            scratch_shapes=[pltpu.VMEM((TB, D_f), jnp.float32)],
            compiler_params=cparams,
            cost_estimate=cost,
        )(x_f, lengths_2d)

    if k > 1:
        # Fold the k lane groups back to D.  This touches only B*k*D elements
        # (negligible vs. the B*S*D HBM traffic of the kernel itself).
        out = out.reshape(B, k, D).sum(axis=1).astype(x.dtype)

    assert out.shape == (B, D)
    assert out.dtype == x.dtype
    return out


# --------------------------------------------------------------------------- #
# Self-test
# --------------------------------------------------------------------------- #
if __name__ == "__main__":
    key = jax.random.PRNGKey(0)
    kx, kl, kx2, kl2 = jax.random.split(key, 4)

    # --- test 1: module-sized shapes (document_embedding_dims = 32) ---------
    B, S, D = 2, 8, 32
    x = jax.random.normal(kx, (B, S, D), dtype=jnp.float32)
    lengths = jax.random.randint(kl, (B,), minval=1, maxval=S + 1).astype(jnp.float32)

    out = jax.block_until_ready(mean_pooling(x, lengths))
    ref = jnp.sum(x, axis=1) / lengths.reshape(-1, 1)
    assert out.shape == (B, D)
    assert jnp.allclose(out, ref, atol=1e-5, rtol=1e-5), (
        f"test1 max abs err {jnp.max(jnp.abs(out - ref))}")

    # --- test 2: force the multi-sequence-tile (accumulator) path -----------
    B2, S2, D2 = 16, 256, 32
    x2 = jax.random.normal(kx2, (B2, S2, D2), dtype=jnp.float32)
    lengths2 = jax.random.randint(kl2, (B2,), minval=1, maxval=S2 + 1).astype(jnp.float32)

    out2 = jax.block_until_ready(mean_pooling(x2, lengths2, target_bytes=4096))
    ref2 = jnp.sum(x2, axis=1) / lengths2.reshape(-1, 1)
    assert out2.shape == (B2, D2)
    assert jnp.allclose(out2, ref2, atol=1e-4, rtol=1e-4), (
        f"test2 max abs err {jnp.max(jnp.abs(out2 - ref2))}")

    print("KERNEL_OK")
</pallas_src>

<mosaic_0001>
module attributes {stable_mosaic.version = 11 : i64} {
  func.func @_mean_pool_kernel_single(%arg0: i32, %arg1: memref<2x2x128xf32, #tpu.memory_space<vmem>>, %arg2: memref<2x1xf32, #tpu.memory_space<vmem>>, %arg3: memref<2x128xf32, #tpu.memory_space<vmem>>) attributes {dimension_semantics = [#tpu.dimension_semantics<parallel>], iteration_bounds = array<i64: 1>, scalar_prefetch = 0 : i64, scratch_operands = 0 : i64, tpu.core_type = #tpu.core_type<tc>, window_params = [{transform_indices = @transform_0, window_bounds = array<i64: 2, 2, 128>}, {transform_indices = @transform_1, window_bounds = array<i64: 2, 1>}, {transform_indices = @transform_2, window_bounds = array<i64: 2, 128>}]} {
    %c0 = arith.constant 0 : index
    %c0_0 = arith.constant 0 : index
    %c0_1 = arith.constant 0 : index
    %0 = vector.load %arg1[%c0, %c0_0, %c0_1] : memref<2x2x128xf32, #tpu.memory_space<vmem>>, vector<2x2x128xf32>
    %cst = arith.constant dense<0.000000e+00> : vector<2x128xf32>
    %1 = vector.multi_reduction <add>, %0, %cst [1] : vector<2x2x128xf32> to vector<2x128xf32>
    %c0_2 = arith.constant 0 : index
    %c0_3 = arith.constant 0 : index
    %2 = vector.load %arg2[%c0_2, %c0_3] : memref<2x1xf32, #tpu.memory_space<vmem>>, vector<2x1xf32>
    %3 = tpu.reciprocal %2 : vector<2x1xf32> -> vector<2x1xf32>
    %4 = vector.broadcast %3 : vector<2x1xf32> to vector<2x128xf32>
    %5 = arith.mulf %1, %4 : vector<2x128xf32>
    %c0_4 = arith.constant 0 : index
    %c0_5 = arith.constant 0 : index
    %6 = vector.load %arg3[%c0_4, %c0_5] : memref<2x128xf32, #tpu.memory_space<vmem>>, vector<2x128xf32>
    tpu.vector_store %arg3[%c0_4, %c0_5], %5 {strides = array<i32>} : memref<2x128xf32, #tpu.memory_space<vmem>>, vector<2x128xf32>,
    return
  }
  func.func @transform_0(%arg0: i32) -> (i32, i32, i32) {
    %c0_i32 = arith.constant 0 : i32
    %c0_i32_0 = arith.constant 0 : i32
    %c0_i32_1 = arith.constant 0 : i32
    return %arg0, %c0_i32, %c0_i32_0 : i32, i32, i32
  }
  func.func @transform_1(%arg0: i32) -> (i32, i32) {
    %c0_i32 = arith.constant 0 : i32
    %c0_i32_0 = arith.constant 0 : i32
    return %arg0, %c0_i32 : i32, i32
  }
  func.func @transform_2(%arg0: i32) -> (i32, i32) {
    %c0_i32 = arith.constant 0 : i32
    %c0_i32_0 = arith.constant 0 : i32
    return %arg0, %c0_i32 : i32, i32
  }
}

</mosaic_0001>

<bundles_post_ra>
// kernel: tpu_custom_call.1
= control target key start
LH: loop header
LB: loop body
LE: loop exit
PB: predicated region body
PF: predicated region fallthrough
CT: control target
= control target key end

     0   :  { %7 = vsyncpa [#allocation3], 0  ;;  %s179_s0 = inlined_call_operand.hbm [shape: f32[2,2,128], index: 0, kind: input, shape index: {}]   ;;  %s180_s1 = inlined_call_operand.vmem [shape: f32[2,1], index: 1, kind: input, shape index: {}]   ;;  %s181_s2 = inlined_call_operand.hbm [shape: f32[2,128], index: 2, kind: output, shape index: {}]  }
   0x1   :  { %8 = vsyncpa [#allocation4], 0  ;;  %s132_s9 = smov [#allocation2]   ;;  %s84_s13 = scalar_lea.hbm %s179_s0, 64 }
   0x2   :  { %s14_s10 = sshll.u32 %s132_s9, 4  ;;  %p85_p0 = scmp.ne.s32.totalorder %s179_s0, %s84_s13  ;;  %s15_s10 = int_to_ptr.vmem [resolvable:$true] %s14_s10 }
   0x3   :  { %p88_p1 = scmp.lt.u32.totalorder %s84_s13, %s179_s0 }
   0x5   :  { %p90_p2 = pnand %p88_p1, %p85_p0 }
   0x7   :  { %93 = shalt.err (!%p90_p2)
}
   0x8   :  { %s94_s18 = scalar_lea.vmem %s15_s10, 64  ;;  %p99_p4 = scmp.lt.s32.totalorder %s15_s10, %s15_s10 }
   0x9   :  { %p95_p3 = scmp.ne.s32.totalorder %s15_s10, %s94_s18  ;;  %p100_p5 = scmp.lt.s32.totalorder %s94_s18, %s94_s18 }
   0xb   :  { %p101_p6 = por %p100_p5, %p99_p4 }
   0xd   :  { %p102_p7 = pnand %p101_p6, %p95_p3 }
   0xf   :  { %105 = shalt.err (!%p102_p7)
}
  0x10   :  { %s133_s19 = smov 32   ;;  %s134_s20 = smov 2  }
  0x11   :  { %20 = dma.hbm_to_vmem [thread:$0]  %s179_s0, 64, %s15_s10, [#allocation3], %s133_s19, %s133_s19, %s134_s20  }
  0x12   :  { %128 = dma.done.wait [#allocation3], 64  }
  0x13   :  { %129 = vsyncadd [#allocation3], 4294967232  ;;  %v135_v0 = vmov 0   ;;  %v43_v1 = vld [vmem:[%s180_s1] sm:$0x3]  ;;  %vm28_vm0 = vcmask 1041408  }
  0x14   :  { %81 = vset.pattern.permute.xlu0 %v135_v0  ;;  %82 = vrcp.f32 %v43_v1  ;;  %v27_v3 = vld [vmem:[#allocation2 + $0x2] sm:$0x3]  ;;  %v26_v4 = vld [vmem:[#allocation2] sm:$0x3]  ;;  %s136_s0 = smov [#allocation5]   ;;  %vm57_vm1 = vcmask 1041409  }
  0x15   :  { %v36_v5 = vsel %vm28_vm0, %v27_v3, 0.0  ;;  %v29_v6 = vsel %vm28_vm0, %v26_v4, 0.0  ;;  %s67_s1 = sshll.u32 %s136_s0, 4  ;;  %s68_s1 = int_to_ptr.vmem [resolvable:$true] %s67_s1 }
  0x16   :  { %v37_v7 = vrot.slane %v36_v5, 4  ;;  %v30_v8 = vrot.slane %v29_v6, 4  ;;  %s106_s25 = scalar_lea.vmem %s68_s1, 32  ;;  %p111_p9 = scmp.lt.s32.totalorder %s68_s1, %s68_s1 }
  0x17   :  { %p107_p8 = scmp.ne.s32.totalorder %s68_s1, %s106_s25  ;;  %p112_p10 = scmp.lt.s32.totalorder %s106_s25, %s106_s25 }
  0x18   :  { %v38_v9 = vadd.f32 %v37_v7, %v36_v5  ;;  %v31_v10 = vadd.f32 %v30_v8, %v29_v6 }
  0x19   :  { %p113_p11 = por %p112_p10, %p111_p9 }
  0x1a   :  { %v39_v11 = vrot.slane %v38_v9, 2  ;;  %v32_v12 = vrot.slane %v31_v10, 2 }
  0x1b   :  { %p114_p12 = pnand %p113_p11, %p107_p8 }
  0x1c   :  { %v40_v13 = vadd.f32 %v39_v11, %v38_v9  ;;  %v33_v14 = vadd.f32 %v32_v12, %v31_v10 }
  0x1e   :  { %v83_v2 = vpop.eup %82  ;;  %v41_v15 = vrot.slane %v40_v13, 1  ;;  %v34_v16 = vrot.slane %v33_v14, 1 }
  0x1f   :  { %47 = vperm.xlu0 %81, %v83_v2  }
  0x20   :  { %v42_v17 = vadd.f32 %v41_v15, %v40_v13  ;;  %v35_v19 = vadd.f32 %v34_v16, %v33_v14 }
  0x9e   :  { %v48_v18 = vpop.permute.xlu0 %47 }
  0x9f   :  { %v49_v20 = vrot.slane %v48_v18, 1  ;;  %v52_v22 = vmul.f32 %v48_v18, %v35_v19 }
  0xa1   :  { %v53_v21 = vmul.f32 %v49_v20, %v42_v17 }
  0xa3   :  { %v56_v23 = vrot.slane %v53_v21, 7 }
  0xa5   :  { %v58_v24 = vsel %vm57_vm1, %v56_v23, %v52_v22 }
  0xa6   :  { %60 = vst [vmem:[#allocation5] sm:$0x3] %v58_v24 }
  0xa7   :  { %117 = shalt.err (!%p114_p12)
}
  0xa8   :  { %s118_s28 = scalar_lea.hbm %s181_s2, 32 }
  0xa9   :  { %p119_p13 = scmp.ne.s32.totalorder %s181_s2, %s118_s28  ;;  %p122_p0 = scmp.lt.u32.totalorder %s118_s28, %s181_s2 }
  0xab   :  { %p124_p1 = pnand %p122_p0, %p119_p13 }
  0xad   :  { %127 = shalt.err (!%p124_p1)
}
  0xae   :  { %70 = dma.vmem_to_hbm [thread:$0]  %s68_s1, 32, %s181_s2, [#allocation4]  }
  0xaf   :  { %130 = dma.done.wait [#allocation4], 32  }
  0xb0   :  { %131 = vsyncadd [#allocation4], 4294967264 }
  0xb1   :  { %74 = vsyncpa [#allocation3], 1 }
  0xb2   :  { %75 = vsyncpa [#allocation4], 1 }

</bundles_post_ra>
